<compile_context>
chip_gen: v7x
topology: tpu7x:2x2x1
jax: 0.10.0
libtpu: 0.0.40
codegen_flags: <defaults>
</compile_context>

<pallas_src>
import functools

import jax
import jax.numpy as jnp
from jax.experimental import pallas as pl
from jax.experimental.pallas import tpu as pltpu

EPS = 1e-5      # PyTorch InstanceNorm2d default eps
LANE = 128      # TPU lane width
SUBLANE = 8     # TPU sublane width


def _cin_kernel(x_ref, gb_ref, o_ref, *, inv_hw):
    # x_ref: (TR, HWp)   gb_ref: (TR, 2) f32 [gamma | beta]   o_ref: (TR, HWp)
    x = x_ref[...].astype(jnp.float32)

    # One pass over the tile: sum and sum-of-squares feed the lane reductions,
    # then per-row scalar math derives mean / biased variance (PyTorch IN).
    # Padded lanes (if any) are zeros, so dividing by the *true* HW stays exact.
    s1 = jnp.sum(x, axis=-1, keepdims=True)
    s2 = jnp.sum(x * x, axis=-1, keepdims=True)
    mean = s1 * inv_hw
    var = jnp.maximum(s2 * inv_hw - mean * mean, 0.0)
    inv = jax.lax.rsqrt(var + EPS)

    gb = gb_ref[...]
    gamma = gb[:, 0:1]
    beta = gb[:, 1:2]

    # Fold normalization + conditional affine into a single FMA per element:
    #   gamma * (x - mean) * inv + beta  ==  x * scale + shift
    scale = gamma * inv
    shift = beta - mean * scale
    o_ref[...] = (x * scale + shift).astype(o_ref.dtype)


def _vmem_capacity_bytes():
    try:
        info = pltpu.get_tpu_info()
        return int(getattr(info, "vmem_capacity_bytes", 64 * 1024 * 1024))
    except Exception:
        return 64 * 1024 * 1024   # v7x per-TC VMEM — smallest of current gens


def conditional_instance_norm2d(x, condition, embed_weight, *, bias=True):
    """x: (N, C, H, W); condition: (N,); embed_weight: (2C, 1) if bias else (C, 1)."""
    N, C, H, W = x.shape
    NC, HW = N * C, H * W

    # ---- glue: the conditioning "embedding" (Linear(1, 2C, bias=False)) ----
    cond = condition.reshape(-1, 1).astype(jnp.float32)          # (N, 1)
    emb = cond @ embed_weight.astype(jnp.float32).T              # (N, 2C) or (N, C)
    if bias:
        gamma, beta = emb[:, :C], emb[:, C:]
    else:
        gamma, beta = emb, jnp.zeros_like(emb)
    # One merged (NC, 2) side input instead of two lane-padded (NC, 1) inputs.
    gb = jnp.stack([gamma.reshape(NC), beta.reshape(NC)], axis=-1)  # (NC, 2) f32

    # ---- layout: one row per (batch, channel) instance, spatial on lanes ----
    x_f = x.reshape(NC, HW)
    HW_pad = pl.cdiv(HW, LANE) * LANE
    if HW_pad != HW:
        # Lane-dense slab (avoids masked partial stores); zero padding keeps the
        # sums exact because we divide by the true HW inside the kernel.
        x_f = jnp.pad(x_f, ((0, 0), (0, HW_pad - HW)))

    # ---- tile sizing: biggest row tile the VMEM budget allows ----
    vmem_phys = _vmem_capacity_bytes()
    itemsize = jnp.dtype(x.dtype).itemsize
    # Per-row VMEM cost with default double buffering: x-in + out tiles, plus
    # the (TR, 2) gamma/beta tile (lane-padded to 128 in VMEM).
    row_bytes = 2 * 2 * HW_pad * itemsize + 2 * LANE * 4
    tile_budget = vmem_phys // 2          # keep half of physical VMEM as headroom

    if NC < SUBLANE:
        TR = NC                                           # block dim == full dim
    else:
        tr_cap = (NC // SUBLANE) * SUBLANE                # <= NC, multiple of 8
        tr_fit = max(SUBLANE, (tile_budget // row_bytes) // SUBLANE * SUBLANE)
        TR = min(tr_cap, tr_fit)
    grid = (pl.cdiv(NC, TR),)                             # partial last block is masked

    footprint = TR * row_bytes
    vmem_limit = int(max(32 << 20, min(footprint + (16 << 20), vmem_phys - (4 << 20))))

    kernel = functools.partial(_cin_kernel, inv_hw=1.0 / HW)
    out_flat = pl.pallas_call(
        kernel,
        out_shape=jax.ShapeDtypeStruct((NC, HW_pad), x.dtype),
        grid_spec=pltpu.PrefetchScalarGridSpec(
            num_scalar_prefetch=0,
            grid=grid,
            in_specs=[
                pl.BlockSpec((TR, HW_pad), lambda i: (i, 0)),
                pl.BlockSpec((TR, 2), lambda i: (i, 0)),
            ],
            out_specs=pl.BlockSpec((TR, HW_pad), lambda i: (i, 0)),
        ),
        compiler_params=pltpu.CompilerParams(
            # "parallel" row axis: on multi-TC chips (v7x) rows shard across cores.
            dimension_semantics=("parallel",),
            vmem_limit_bytes=vmem_limit,
        ),
        # NOTE: pipeline_mode=pl.Buffered(3) on the x input is an optional,
        # measure-first tweak once per-generation tile sizes are locked in.
    )(x_f, gb)

    if HW_pad != HW:
        out_flat = out_flat[:, :HW]
    return out_flat.reshape(N, C, H, W)


def _reference(x, condition, embed_weight, *, bias=True):
    # pure-JAX reference for correctness checking
    N, C, H, W = x.shape
    cond = condition.reshape(-1, 1).astype(jnp.float32)
    emb = cond @ embed_weight.astype(jnp.float32).T
    if bias:
        gamma, beta = emb[:, :C], emb[:, C:]
    else:
        gamma, beta = emb, jnp.zeros_like(emb)
    xf = x.astype(jnp.float32)
    mean = xf.mean(axis=(2, 3), keepdims=True)
    var = ((xf - mean) ** 2).mean(axis=(2, 3), keepdims=True)
    h = (xf - mean) * jax.lax.rsqrt(var + EPS)
    return (gamma.reshape(N, C, 1, 1) * h + beta.reshape(N, C, 1, 1)).astype(x.dtype)


if __name__ == "__main__":
    key = jax.random.PRNGKey(0)
    k_x, k_c, k_w, k_x2, k_c2 = jax.random.split(key, 5)

    # --- Case 1: module-spec shapes (N=2, C=4, 16x16): NC=8, HW=256 (lane-dense) ---
    N, C, H, W = 2, 4, 16, 16
    x = jax.random.normal(k_x, (N, C, H, W), dtype=jnp.float32)
    condition = jax.random.normal(k_c, (N,), dtype=jnp.float32)
    # Deterministic init matching the PyTorch __init__ (num_classes=None, bias=True):
    # embed = nn.Linear(1, 2C, bias=False), weight (2C, 1); the [:, :C] slice covers
    # the whole weight -> N(1, 0.02); the [:, C:] slice is empty so nothing is zeroed.
    embed_weight = 1.0 + 0.02 * jax.random.normal(k_w, (2 * C, 1), dtype=jnp.float32)

    out = jax.block_until_ready(
        conditional_instance_norm2d(x, condition, embed_weight, bias=True))
    ref = _reference(x, condition, embed_weight, bias=True)
    assert out.shape == (N, C, H, W)
    assert jnp.allclose(out, ref, atol=1e-4, rtol=1e-4), "case1 mismatch vs reference"

    # --- Case 2: NC not a multiple of the tile, HW not a multiple of 128 ---
    # (exercises cdiv + masked partial row blocks and the lane-padding path)
    N2, C2, H2, W2 = 3, 5, 10, 10
    x2 = jax.random.normal(k_x2, (N2, C2, H2, W2), dtype=jnp.float32)
    cond2 = jax.random.normal(k_c2, (N2,), dtype=jnp.float32)
    ew2 = 1.0 + 0.02 * jax.random.normal(k_w, (2 * C2, 1), dtype=jnp.float32)

    out2 = jax.block_until_ready(
        conditional_instance_norm2d(x2, cond2, ew2, bias=True))
    ref2 = _reference(x2, cond2, ew2, bias=True)
    assert out2.shape == (N2, C2, H2, W2)
    assert jnp.allclose(out2, ref2, atol=1e-4, rtol=1e-4), "case2 mismatch vs reference"

    print("KERNEL_OK")
</pallas_src>

<mosaic_0001>
module attributes {stable_mosaic.version = 11 : i64} {
  func.func @_cin_kernel(%arg0: i32, %arg1: memref<8x256xf32, #tpu.memory_space<vmem>>, %arg2: memref<8x2xf32, #tpu.memory_space<vmem>>, %arg3: memref<8x256xf32, #tpu.memory_space<vmem>>) attributes {dimension_semantics = [#tpu.dimension_semantics<parallel>], iteration_bounds = array<i64: 1>, scalar_prefetch = 0 : i64, scratch_operands = 0 : i64, tpu.core_type = #tpu.core_type<tc>, window_params = [{transform_indices = @transform_0, window_bounds = array<i64: 8, 256>}, {transform_indices = @transform_1, window_bounds = array<i64: 8, 2>}, {transform_indices = @transform_2, window_bounds = array<i64: 8, 256>}]} {
    %c0 = arith.constant 0 : index
    %c0_0 = arith.constant 0 : index
    %0 = vector.load %arg1[%c0, %c0_0] : memref<8x256xf32, #tpu.memory_space<vmem>>, vector<8x256xf32>
    %cst = arith.constant dense<0.000000e+00> : vector<8xf32>
    %1 = vector.multi_reduction <add>, %0, %cst [1] : vector<8x256xf32> to vector<8xf32>
    %2 = vector.shape_cast %1 : vector<8xf32> to vector<8x1xf32>
    %3 = arith.mulf %0, %0 : vector<8x256xf32>
    %cst_1 = arith.constant dense<0.000000e+00> : vector<8xf32>
    %4 = vector.multi_reduction <add>, %3, %cst_1 [1] : vector<8x256xf32> to vector<8xf32>
    %5 = vector.shape_cast %4 : vector<8xf32> to vector<8x1xf32>
    %cst_2 = arith.constant 3.906250e-03 : f32
    %6 = vector.broadcast %cst_2 : f32 to vector<8x1xf32>
    %7 = arith.mulf %2, %6 : vector<8x1xf32>
    %cst_3 = arith.constant 3.906250e-03 : f32
    %8 = vector.broadcast %cst_3 : f32 to vector<8x1xf32>
    %9 = arith.mulf %5, %8 : vector<8x1xf32>
    %10 = arith.mulf %7, %7 : vector<8x1xf32>
    %11 = arith.subf %9, %10 : vector<8x1xf32>
    %cst_4 = arith.constant 0.000000e+00 : f32
    %12 = vector.broadcast %cst_4 : f32 to vector<8x1xf32>
    %13 = arith.maximumf %11, %12 : vector<8x1xf32>
    %cst_5 = arith.constant 9.99999974E-6 : f32
    %14 = vector.broadcast %cst_5 : f32 to vector<8x1xf32>
    %15 = arith.addf %13, %14 : vector<8x1xf32>
    %16 = math.rsqrt %15 : vector<8x1xf32>
    %c0_6 = arith.constant 0 : index
    %c0_7 = arith.constant 0 : index
    %17 = vector.load %arg2[%c0_6, %c0_7] : memref<8x2xf32, #tpu.memory_space<vmem>>, vector<8x2xf32>
    %18 = vector.extract_strided_slice %17 {offsets = [0, 0], sizes = [8, 1], strides = [1, 1]} : vector<8x2xf32> to vector<8x1xf32>
    %19 = vector.extract_strided_slice %17 {offsets = [0, 1], sizes = [8, 1], strides = [1, 1]} : vector<8x2xf32> to vector<8x1xf32>
    %20 = arith.mulf %18, %16 : vector<8x1xf32>
    %21 = arith.mulf %7, %20 : vector<8x1xf32>
    %22 = arith.subf %19, %21 : vector<8x1xf32>
    %23 = vector.broadcast %20 : vector<8x1xf32> to vector<8x256xf32>
    %24 = arith.mulf %0, %23 : vector<8x256xf32>
    %25 = vector.broadcast %22 : vector<8x1xf32> to vector<8x256xf32>
    %26 = arith.addf %24, %25 : vector<8x256xf32>
    %c0_8 = arith.constant 0 : index
    %c0_9 = arith.constant 0 : index
    %27 = vector.load %arg3[%c0_8, %c0_9] : memref<8x256xf32, #tpu.memory_space<vmem>>, vector<8x256xf32>
    tpu.vector_store %arg3[%c0_8, %c0_9], %26 {strides = array<i32>} : memref<8x256xf32, #tpu.memory_space<vmem>>, vector<8x256xf32>,
    return
  }
  func.func @transform_0(%arg0: i32) -> (i32, i32) {
    %c0_i32 = arith.constant 0 : i32
    %c0_i32_0 = arith.constant 0 : i32
    return %arg0, %c0_i32 : i32, i32
  }
  func.func @transform_1(%arg0: i32) -> (i32, i32) {
    %c0_i32 = arith.constant 0 : i32
    %c0_i32_0 = arith.constant 0 : i32
    return %arg0, %c0_i32 : i32, i32
  }
  func.func @transform_2(%arg0: i32) -> (i32, i32) {
    %c0_i32 = arith.constant 0 : i32
    %c0_i32_0 = arith.constant 0 : i32
    return %arg0, %c0_i32 : i32, i32
  }
}

</mosaic_0001>

<bundles_post_ra>
// kernel: tpu_custom_call.1
= control target key start
LH: loop header
LB: loop body
LE: loop exit
PB: predicated region body
PF: predicated region fallthrough
CT: control target
= control target key end

     0   :  { %7 = vsyncpa [#allocation3], 0  ;;  %s184_s0 = inlined_call_operand.hbm [shape: f32[8,256], index: 0, kind: input, shape index: {}]   ;;  %s185_s1 = inlined_call_operand.vmem [shape: f32[8,2], index: 1, kind: input, shape index: {}]   ;;  %s186_s2 = inlined_call_operand.hbm [shape: f32[8,256], index: 2, kind: output, shape index: {}]  }
   0x1   :  { %8 = vsyncpa [#allocation4], 0  ;;  %s137_s9 = smov [#allocation2]   ;;  %s89_s13 = scalar_lea.hbm %s184_s0, 256 }
   0x2   :  { %s15_s10 = sshll.u32 %s137_s9, 4  ;;  %p90_p0 = scmp.ne.s32.totalorder %s184_s0, %s89_s13  ;;  %s16_s10 = int_to_ptr.vmem [resolvable:$true] %s15_s10 }
   0x3   :  { %p93_p1 = scmp.lt.u32.totalorder %s89_s13, %s184_s0 }
   0x5   :  { %p95_p2 = pnand %p93_p1, %p90_p0 }
   0x7   :  { %98 = shalt.err (!%p95_p2)
}
   0x8   :  { %s99_s18 = scalar_lea.vmem %s16_s10, 256  ;;  %p104_p4 = scmp.lt.s32.totalorder %s16_s10, %s16_s10 }
   0x9   :  { %p100_p3 = scmp.ne.s32.totalorder %s16_s10, %s99_s18  ;;  %p105_p5 = scmp.lt.s32.totalorder %s99_s18, %s99_s18 }
   0xb   :  { %p106_p6 = por %p105_p5, %p104_p4 }
   0xd   :  { %p107_p7 = pnand %p106_p6, %p100_p3 }
   0xf   :  { %110 = shalt.err (!%p107_p7)
}
  0x10   :  { %18 = dma.hbm_to_vmem [thread:$0]  %s184_s0, 256, %s16_s10, [#allocation3]  }
  0x11   :  { %133 = dma.done.wait [#allocation3], 256  }
  0x12   :  { %134 = vsyncadd [#allocation3], 4294967040  ;;  %v24_v0 = vld [vmem:[#allocation2] sm:$0xff]  ;;  %v25_v1 = vld [vmem:[#allocation2 + $0x8] sm:$0xff]  ;;  %v138_v6 = vmov 0   ;;  %v139_v15 = vmov 1  }
  0x13   :  { %v26_v2 = vadd.f32 %v25_v1, %v24_v0  ;;  %v29_v3 = vmul.f32 %v24_v0, %v24_v0  ;;  %v30_v4 = vmul.f32 %v25_v1, %v25_v1  ;;  %85 = vset.pattern.permute.xlu1 %v138_v6  ;;  %86 = vset.pattern.permute.xlu0 %v139_v15  ;;  %v41_v16 = vld [vmem:[%s185_s1] sm:$0xff]  ;;  %s140_s22 = smov 1   ;;  %s141_s23 = smov [#allocation5]  }
  0x14   :  { %s71_s24 = sshll.u32 %s141_s23, 4  ;;  %s72_s24 = int_to_ptr.vmem [resolvable:$true] %s71_s24 }
  0x15   :  { %27 = vadd.xlane.f32.xlu0 %v26_v2  ;;  %v31_v5 = vadd.f32 %v30_v4, %v29_v3  ;;  %s111_s1 = scalar_lea.vmem %s72_s24, 256  ;;  %p116_p9 = scmp.lt.s32.totalorder %s72_s24, %s72_s24 }
  0x16   :  { %p112_p8 = scmp.ne.s32.totalorder %s72_s24, %s111_s1  ;;  %p117_p10 = scmp.lt.s32.totalorder %s111_s1, %s111_s1 }
  0x18   :  { %p118_p11 = por %p117_p10, %p116_p9 }
  0x19   :  { %32 = vadd.xlane.f32.xlu0 %v31_v5 }
  0x1a   :  { %p119_p12 = pnand %p118_p11, %p112_p8 }
  0xa2   :  { %v28_v7 = vpop.xlane.xlu0 %27 }
  0xa3   :  { %v34_v8 = vmul.f32 0.00390625, %v28_v7 }
  0xa5   :  { %v36_v10 = vmul.f32 %v34_v8, %v34_v8 }
  0xa6   :  { %v33_v9 = vpop.xlane.xlu0 %32 }
  0xa7   :  { %v35_v11 = vmul.f32 0.00390625, %v33_v9 }
  0xa9   :  { %v37_v12 = vsub.f32 %v35_v11, %v36_v10 }
  0xab   :  { %v38_v13 = vmax.f32 %v37_v12, 0.0 }
  0xad   :  { %v39_v14 = vadd.f32 1e-05, %v38_v13 }
  0xaf   :  { %87 = vrsqrt.f32 %v39_v14 }
  0xb9   :  { %v88_v17 = vpop.eup %87 }
  0xba   :  { %v42_v18 = vmul.f32 %v88_v17, %v41_v16 }
  0xbc   :  { %v43_v19 = vmul.f32 %v42_v18, %v34_v8 }
  0xbe   :  { %45 = vrot.lane.b32.xlu1 %v43_v19, %s140_s22 }
  0xc2   :  { %51 = vperm.xlu1 %85, %v42_v18  }
 0x130   :  { %v46_v20 = vpop.permute.xlu1 %45 }
 0x131   :  { %v48_v21 = vsub.f32 %v41_v16, %v46_v20 }
 0x133   :  { %58 = vperm.xlu0 %86, %v48_v21  }
 0x141   :  { %v52_v22 = vpop.permute.xlu1 %51 }
 0x142   :  { %v54_v23 = vmul.f32 %v52_v22, %v24_v0  ;;  %v55_v24 = vmul.f32 %v52_v22, %v25_v1 }
 0x1b2   :  { %v59_v25 = vpop.permute.xlu0 %58 }
 0x1b3   :  { %v61_v26 = vadd.f32 %v59_v25, %v54_v23  ;;  %v62_v27 = vadd.f32 %v59_v25, %v55_v24 }
 0x1b5   :  { %63 = vst [vmem:[#allocation5] sm:$0xff] %v61_v26  ;;  %64 = vst [vmem:[#allocation5 + $0x8] sm:$0xff] %v62_v27 }
 0x1b6   :  { %122 = shalt.err (!%p119_p12)
}
 0x1b7   :  { %s123_s27 = scalar_lea.hbm %s186_s2, 256 }
 0x1b8   :  { %p124_p13 = scmp.ne.s32.totalorder %s186_s2, %s123_s27  ;;  %p127_p0 = scmp.lt.u32.totalorder %s123_s27, %s186_s2 }
 0x1ba   :  { %p129_p1 = pnand %p127_p0, %p124_p13 }
 0x1bc   :  { %132 = shalt.err (!%p129_p1)
}
 0x1bd   :  { %74 = dma.vmem_to_hbm [thread:$0]  %s72_s24, 256, %s186_s2, [#allocation4]  }
 0x1be   :  { %135 = dma.done.wait [#allocation4], 256  }
 0x1bf   :  { %136 = vsyncadd [#allocation4], 4294967040 }
 0x1c0   :  { %78 = vsyncpa [#allocation3], 1 }
 0x1c1   :  { %79 = vsyncpa [#allocation4], 1 }

</bundles_post_ra>
